<compile_context>
chip_gen: v5e
topology: v5e:2x2
jax: 0.10.0
libtpu: 0.0.40
codegen_flags: <defaults>
</compile_context>

<pallas_src>
import numpy as np

import jax
import jax.numpy as jnp
from jax.experimental import pallas as pl
from jax.experimental.pallas import tpu as pltpu

N_CLASSES = 361          # fixed by the PyTorch module (nn.Linear(dim, 361))
N_PAD = 384              # 361 rounded up to a multiple of 128 (lane-dense compute)
_NEG_BIG = -1e30         # finite "minus infinity" for padded bias lanes


def _round_up(a, b):
    return ((a + b - 1) // b) * b


def _pathpredict_kernel(x_ref, w_ref, b_ref, o_ref):
    # x: (TILE_M, D) native dtype, w: (D, N_PAD) bf16, b: (1, N_PAD) f32
    # o: (TILE_M, N_CLASSES) f32 (or bf16)
    x = x_ref[...].astype(jnp.bfloat16)                        # no-op for bf16 inputs
    logits = jnp.dot(x, w_ref[...],
                     preferred_element_type=jnp.float32) + b_ref[...]
    # numerically-stable softmax along lanes; padded lanes (bias=-1e30) -> exp == 0
    m = jnp.max(logits, axis=-1, keepdims=True)
    e = jnp.exp(logits - m)
    # exact reciprocal so rows sum to 1.0 to f32 rounding (approx EUP recip was
    # ~2^-8 off); one divide per row, hidden under the HBM store.
    inv = 1.0 / jnp.sum(e, axis=-1, keepdims=True)
    # store only the 361 real classes: 2 full vregs + 1 masked column per 8 rows
    o_ref[...] = (e[:, :N_CLASSES] * inv).astype(o_ref.dtype)


def prepare_path_predict_params(weight, bias):
    """One-off parameter prep (hoist out of the per-call path).

    weight: (D, 361) (PyTorch fc.weight is (361, D) -> pass fc.weight.T)
    bias:   (361,)
    Returns (w_pad, b_pad): (D, 384) bf16 zero-padded weight, (1, 384) f32 bias
    with -1e30 in the 23 padded lanes.
    """
    w_pad = jnp.pad(weight.astype(jnp.bfloat16),
                    ((0, 0), (0, N_PAD - N_CLASSES)))                     # zero cols
    b_pad = jnp.pad(bias.astype(jnp.float32).reshape(1, N_CLASSES),
                    ((0, 0), (0, N_PAD - N_CLASSES)),
                    constant_values=_NEG_BIG)                             # -1e30 lanes
    return w_pad, b_pad


def _choose_tile_m(m, d, x_itemsize, out_itemsize, *, target=512,
                   vmem_budget=12 << 20):
    """Largest row tile (multiple of 16) fitting the scoped-VMEM budget.

    Budget ~= 2*tile_m*d*szof(x) + 2*tile_m*N_PAD*szof(out)    (double-buffered)
            + 2*(d*N_PAD*2 + N_PAD*4)                          (weight + bias)
    12 MiB keeps headroom under v5e's 16 MiB default scoped limit while staying
    in the 512-row sweet spot (~85% of HBM roofline) whenever it fits.
    """
    if m < 32:
        return m                          # single block == full row extent (legal)
    fixed = 2 * (d * N_PAD * 2 + N_PAD * 4)
    per_row = 2 * (d * x_itemsize + N_PAD * out_itemsize)
    fit = max((vmem_budget - fixed) // per_row, 16)
    tile = min(target, fit)
    # >= 2 row tiles so both v7x TensorCores get a tile under ("parallel",)
    tile = min(tile, _round_up(pl.cdiv(m, 2), 16))
    return max(16, (int(tile) // 16) * 16)


def path_predict(token, w_pad, b_pad, *, out_dtype=jnp.float32, tile_m=None):
    """softmax(token @ W + b) along the last axis.

    token: (..., D) in its native dtype (f32 or bf16 — no upcast is performed).
    w_pad, b_pad: outputs of prepare_path_predict_params.
    out_dtype=jnp.bfloat16 halves the dominant HBM store traffic if callers
    accept bf16 probabilities (default f32 matches the PyTorch module).
    Returns (..., 361).
    """
    lead = token.shape[:-1]
    d = token.shape[-1]
    x = token.reshape(-1, d)                      # native dtype: no extra HBM pass
    m = x.shape[0]

    if tile_m is None:
        tile_m = _choose_tile_m(m, d, x.dtype.itemsize,
                                np.dtype(out_dtype).itemsize)
    n_tiles = pl.cdiv(m, tile_m)                  # ragged last tile is OOB-masked

    out = pl.pallas_call(
        _pathpredict_kernel,
        out_shape=jax.ShapeDtypeStruct((m, N_CLASSES), out_dtype),
        grid_spec=pltpu.PrefetchScalarGridSpec(
            num_scalar_prefetch=0,
            grid=(n_tiles,),
            in_specs=[
                pl.BlockSpec((tile_m, d), lambda i: (i, 0)),
                # Constant-index weight/bias blocks stay VMEM-resident; their
                # default double-buffering is already accounted for in the
                # tile_m VMEM budget (pl.Buffered(1) would shave it further).
                pl.BlockSpec((d, N_PAD), lambda i: (0, 0)),    # bf16 weight
                pl.BlockSpec((1, N_PAD), lambda i: (0, 0)),    # f32 bias
            ],
            out_specs=pl.BlockSpec((tile_m, N_CLASSES), lambda i: (i, 0)),
        ),
        compiler_params=pltpu.CompilerParams(
            dimension_semantics=("parallel",)),   # shard row tiles across TCs
    )(x, w_pad, b_pad)

    return out.reshape(*lead, N_CLASSES)


if __name__ == "__main__":
    # small shapes consistent with the forward: token (batch, seq, dim)
    batch, seq, dim = 2, 8, 32

    key = jax.random.PRNGKey(0)
    k_tok, k_w, k_b = jax.random.split(key, 3)
    token = jax.random.normal(k_tok, (batch, seq, dim), dtype=jnp.float32)
    # deterministic synthetic parameters (nn.Linear(dim, 361), weight given as (dim, 361))
    weight = jax.random.normal(k_w, (dim, N_CLASSES), dtype=jnp.float32) * 0.05
    bias = jax.random.normal(k_b, (N_CLASSES,), dtype=jnp.float32) * 0.01

    w_pad, b_pad = prepare_path_predict_params(weight, bias)   # hoisted, one-off

    out = path_predict(token, w_pad, b_pad)
    out = jax.block_until_ready(out)
    assert out.shape == (batch, seq, N_CLASSES)
    assert out.dtype == jnp.float32

    # bf16-MXU-consistent reference (matches the kernel's input/weight cast)
    logits_bf = jnp.dot(token.reshape(-1, dim).astype(jnp.bfloat16),
                        weight.astype(jnp.bfloat16),
                        preferred_element_type=jnp.float32) + bias
    ref_bf = jax.nn.softmax(logits_bf, axis=-1).reshape(batch, seq, N_CLASSES)
    # pure f32 reference (original module semantics)
    ref_f32 = jax.nn.softmax(token @ weight + bias, axis=-1)

    assert jnp.allclose(out, ref_bf, atol=2e-4, rtol=1e-3)     # kernel-exact path
    assert jnp.allclose(out, ref_f32, atol=5e-3)               # bf16 rounding slack
    assert jnp.allclose(jnp.sum(out, axis=-1), 1.0, atol=1e-3) # exact normalization

    print("KERNEL_OK")
</pallas_src>

<mosaic_0001>
module attributes {stable_mosaic.version = 11 : i64} {
  func.func @_pathpredict_kernel(%arg0: i32, %arg1: memref<16x32xf32, #tpu.memory_space<vmem>>, %arg2: memref<32x384xbf16, #tpu.memory_space<vmem>>, %arg3: memref<1x384xf32, #tpu.memory_space<vmem>>, %arg4: memref<16x361xf32, #tpu.memory_space<vmem>>) attributes {dimension_semantics = [#tpu.dimension_semantics<parallel>], iteration_bounds = array<i64: 1>, scalar_prefetch = 0 : i64, scratch_operands = 0 : i64, tpu.core_type = #tpu.core_type<tc>, window_params = [{transform_indices = @transform_0, window_bounds = array<i64: 16, 32>}, {pipeline_mode = #tpu.pipeline_mode<synchronous>, transform_indices = @transform_1, window_bounds = array<i64: 32, 384>}, {pipeline_mode = #tpu.pipeline_mode<synchronous>, transform_indices = @transform_2, window_bounds = array<i64: 1, 384>}, {transform_indices = @transform_3, window_bounds = array<i64: 16, 361>}]} {
    %c0 = arith.constant 0 : index
    %c0_0 = arith.constant 0 : index
    %0 = vector.load %arg1[%c0, %c0_0] : memref<16x32xf32, #tpu.memory_space<vmem>>, vector<16x32xf32>
    %1 = arith.truncf %0 : vector<16x32xf32> to vector<16x32xbf16>
    %c0_1 = arith.constant 0 : index
    %c0_2 = arith.constant 0 : index
    %2 = vector.load %arg2[%c0_1, %c0_2] : memref<32x384xbf16, #tpu.memory_space<vmem>>, vector<32x384xbf16>
    %cst = arith.constant dense<0.000000e+00> : vector<16x384xf32>
    %3 = tpu.matmul %1, %2, %cst {dimension_numbers = #tpu.dot_dimension_numbers<[1], [0], [0], [1], [0, 0, 1, 1], [], []>} : vector<16x32xbf16>, vector<32x384xbf16>, vector<16x384xf32> -> vector<16x384xf32>
    %c0_3 = arith.constant 0 : index
    %c0_4 = arith.constant 0 : index
    %4 = vector.load %arg3[%c0_3, %c0_4] : memref<1x384xf32, #tpu.memory_space<vmem>>, vector<1x384xf32>
    %5 = vector.broadcast %4 : vector<1x384xf32> to vector<16x384xf32>
    %6 = arith.addf %3, %5 : vector<16x384xf32>
    %cst_5 = arith.constant dense<0xFF800000> : vector<16xf32>
    %7 = vector.multi_reduction <maximumf>, %6, %cst_5 [1] : vector<16x384xf32> to vector<16xf32>
    %8 = vector.shape_cast %7 : vector<16xf32> to vector<16x1xf32>
    %9 = vector.broadcast %8 : vector<16x1xf32> to vector<16x384xf32>
    %10 = arith.subf %6, %9 : vector<16x384xf32>
    %11 = math.exp %10 : vector<16x384xf32>
    %cst_6 = arith.constant dense<0.000000e+00> : vector<16xf32>
    %12 = vector.multi_reduction <add>, %11, %cst_6 [1] : vector<16x384xf32> to vector<16xf32>
    %13 = vector.shape_cast %12 : vector<16xf32> to vector<16x1xf32>
    %cst_7 = arith.constant 1.000000e+00 : f32
    %14 = vector.broadcast %cst_7 : f32 to vector<16x1xf32>
    %15 = arith.divf %14, %13 : vector<16x1xf32>
    %16 = vector.extract_strided_slice %11 {offsets = [0, 0], sizes = [16, 361], strides = [1, 1]} : vector<16x384xf32> to vector<16x361xf32>
    %17 = vector.broadcast %15 : vector<16x1xf32> to vector<16x361xf32>
    %18 = arith.mulf %16, %17 : vector<16x361xf32>
    %c0_8 = arith.constant 0 : index
    %c0_9 = arith.constant 0 : index
    %19 = vector.load %arg4[%c0_8, %c0_9] : memref<16x361xf32, #tpu.memory_space<vmem>>, vector<16x361xf32>
    tpu.vector_store %arg4[%c0_8, %c0_9], %18 {strides = array<i32>} : memref<16x361xf32, #tpu.memory_space<vmem>>, vector<16x361xf32>,
    return
  }
  func.func @transform_0(%arg0: i32) -> (i32, i32) {
    %c0_i32 = arith.constant 0 : i32
    %c0_i32_0 = arith.constant 0 : i32
    return %arg0, %c0_i32 : i32, i32
  }
  func.func @transform_1(%arg0: i32) -> (i32, i32) {
    %c0_i32 = arith.constant 0 : i32
    %c0_i32_0 = arith.constant 0 : i32
    %c0_i32_1 = arith.constant 0 : i32
    return %c0_i32, %c0_i32_0 : i32, i32
  }
  func.func @transform_2(%arg0: i32) -> (i32, i32) {
    %c0_i32 = arith.constant 0 : i32
    %c0_i32_0 = arith.constant 0 : i32
    %c0_i32_1 = arith.constant 0 : i32
    return %c0_i32, %c0_i32_0 : i32, i32
  }
  func.func @transform_3(%arg0: i32) -> (i32, i32) {
    %c0_i32 = arith.constant 0 : i32
    %c0_i32_0 = arith.constant 0 : i32
    return %arg0, %c0_i32 : i32, i32
  }
}

</mosaic_0001>

<bundles_post_ra>
// kernel: tpu_custom_call.1
= control target key start
LH: loop header
LB: loop body
LE: loop exit
PB: predicated region body
PF: predicated region fallthrough
CT: control target
= control target key end

     0   :  { %8 = vsyncpa [#allocation3], 0  ;;  %s460_s0 = inlined_call_operand.hbm [shape: f32[16,32], index: 0, kind: input, shape index: {}]   ;;  %s461_s1 = inlined_call_operand.hbm [shape: bf16[32,384], index: 1, kind: input, shape index: {}]   ;;  %s462_s2 = inlined_call_operand.hbm [shape: f32[1,384], index: 2, kind: input, shape index: {}]   ;;  %s463_s3 = inlined_call_operand.hbm [shape: f32[16,361], index: 3, kind: output, shape index: {}]  }
   0x1   :  { %9 = vsyncpa [#allocation6], 0  ;;  %s28_s14 = sshll.u32 %s461_s1, 4  ;;  %s29_s14 = int_to_ptr.hbm [resolvable:$true] %s28_s14 }
   0x2   :  { %10 = vsyncpa [#allocation4], 0  ;;  %s416_s15 = smov [#allocation5]   ;;  %s15_s19 = sshll.u32 %s460_s0, 4  ;;  %s16_s19 = int_to_ptr.hbm [resolvable:$true] %s15_s19 }
   0x3   :  { %s30_s16 = sshll.u32 %s416_s15, 4  ;;  %s417_s20 = smov 192   ;;  %s31_s16 = int_to_ptr.vmem [resolvable:$true] %s30_s16 }
   0x4   :  { %s418_s21 = smov 12   ;;  %s419_s22 = smov [#allocation2]  }
   0x5   :  { %36 = dma.hbm_to_vmem [thread:$0]  %s29_s14, 768, %s31_s16, [#allocation6], %s417_s20, %s417_s20, %s418_s21  }
   0x6   :  { %s17_s23 = sshll.u32 %s419_s22, 4  ;;  %s420_s24 = smov 128   ;;  %s18_s23 = int_to_ptr.vmem [resolvable:$true] %s17_s23 }
   0x7   :  { %s421_s25 = smov 8   ;;  %s42_s27 = sshll.u32 %s462_s2, 4  ;;  %s43_s27 = int_to_ptr.hbm [resolvable:$true] %s42_s27 }
   0x8   :  { %23 = dma.hbm_to_vmem [thread:$0]  %s16_s19, 256, %s18_s23, [#allocation3], %s420_s24, %s420_s24, %s421_s25  }
   0x9   :  { %s422_s28 = smov [#allocation7]  }
   0xa   :  { %s44_s29 = sshll.u32 %s422_s28, 4  ;;  %s45_s29 = int_to_ptr.vmem [resolvable:$true] %s44_s29 }
   0xb   :  { %47 = dma.hbm_to_vmem [thread:$0]  %s43_s27, 48, %s45_s29, [#allocation6]  }
   0xc   :  { %410 = dma.done.wait [#allocation3], 256  }
   0xd   :  { %411 = vsyncadd [#allocation3], 4294967040 }
   0xe   :  { %412 = dma.done.wait [#allocation6], 816  }
   0xf   :  { %413 = vsyncadd [#allocation6], 4294966480  ;;  %v269_v0 = vld [vmem:[#allocation5 + $0x18] sm:$0xf]  ;;  %v286_v1 = vld [vmem:[#allocation5 + $0x20] sm:$0xf0] }
  0x10   :  { %v285_v2 = vld [vmem:[#allocation5 + $0x1c] sm:$0xf]  ;;  %v270_v3 = vor.u32 %v286_v1, %v269_v0  ;;  %v271_v4 = vld [vmem:[#allocation5 + $0x24] sm:$0xf0]  ;;  %v277_v5 = vld [vmem:[#allocation5 + $0x20] sm:$0xf] }
  0x11   :  { %v287_v6 = vld [vmem:[#allocation5 + $0x28] sm:$0xf0]  ;;  %v274_v7 = vor.u32 %v285_v2, %v271_v4  ;;  %v257_v9 = vld [vmem:[#allocation5] sm:$0xf]  ;;  %v282_v11 = vld [vmem:[#allocation5 + $0x4] sm:$0xf] }
  0x12   :  { %v278_v8 = vor.u32 %v287_v6, %v277_v5  ;;  %v283_v10 = vld [vmem:[#allocation5 + $0x8] sm:$0xf0]  ;;  %122 = vmatpush.bf16.msra.mxu0 %v270_v3  ;;  %v259_v13 = vld [vmem:[#allocation5 + $0xc] sm:$0xf0]  ;;  %v265_v14 = vld [vmem:[#allocation5 + $0x8] sm:$0xf] }
  0x13   :  { %v258_v12 = vor.u32 %v283_v10, %v257_v9  ;;  %v284_v15 = vld [vmem:[#allocation5 + $0x10] sm:$0xf0]  ;;  %136 = vmatpush.bf16.msra.mxu1 %v274_v7  ;;  %v262_v16 = vor.u32 %v282_v11, %v259_v13  ;;  %v62_v19 = vld [vmem:[#allocation2 + $0x8] sm:$0xff]  ;;  %vm112_vm0 = vcmask 261120   ;;  %v72_v21 = vld [vmem:[#allocation7] sm:$0x7] }
  0x14   :  { %150 = vmatpush.bf16.msra.mxu2 %v278_v8  ;;  %v266_v17 = vor.u32 %v284_v15, %v265_v14  ;;  %v61_v18 = vld [vmem:[#allocation2] sm:$0xff]  ;;  %v74_v22 = vperm.slane %v72_v21, 0  ;;  %v75_v24 = vperm.slane %v72_v21, 1  ;;  %v76_v25 = vperm.slane %v72_v21, 2  ;;  %s423_s0 = smov [#allocation8]   ;;  %s241_s5 = sshll.u32 %s463_s3, 4  ;;  %s242_s5 = int_to_ptr.hbm [resolvable:$true] %s241_s5 }
  0x15   :  { %v63_v20 = vpack.c.bf16 %v62_v19, %v61_v18  ;;  %vm230_vm5 = vcmask 859136   ;;  %s239_s2 = sshll.u32 %s423_s0, 4  ;;  %s424_s6 = smov 384   ;;  %s240_s2 = int_to_ptr.vmem [resolvable:$true] %s239_s2 }
  0x16   :  { %123 = vmatpush.bf16.msra.mxu0 %v258_v12  ;;  %s425_s7 = smov 24  }
  0x17   :  { %137 = vmatpush.bf16.msra.mxu1 %v262_v16 }
  0x18   :  { %151 = vmatpush.bf16.msra.mxu2 %v266_v17 }
  0x19   :  { %279 = vmatmul.msk.bf16.vlgmr.msra.gmra.mxu0 %vm112_vm0, %v63_v20 }
  0x1a   :  { %280 = vmatmul.msk.bf16.vlgmr.msra.gmra.mxu1 %vm112_vm0, %v63_v20 }
  0x1b   :  { %281 = vmatmul.msk.bf16.vlgmr.msra.gmra.mxu2 %vm112_vm0, %v63_v20 }
  0x96   :  { %v125_v23 = vpop.f32.mrf.mxu0 }
  0x97   :  { %v139_v26 = vpop.f32.mrf.mxu1  ;;  %v126_v27 = vadd.f32 %v125_v23, %v74_v22 }
  0x98   :  { %v140_v29 = vadd.f32 %v139_v26, %v75_v24 }
  0x9e   :  { %v153_v28 = vpop.f32.mrf.mxu2  ;;  %v127_v33 = vpop.f32.mrf.mxu0 }
  0x9f   :  { %v154_v30 = vadd.f32 %v153_v28, %v76_v25  ;;  %v141_v34 = vpop.f32.mrf.mxu1  ;;  %v128_v36 = vadd.f32 %v127_v33, %v74_v22 }
  0xa0   :  { %v142_v38 = vadd.f32 %v141_v34, %v75_v24 }
  0xa1   :  { %v158_v31 = vmax.f32 %v126_v27, %v154_v30 }
  0xa3   :  { %v159_v32 = vmax.f32 %v158_v31, %v140_v29 }
  0xa5   :  { %160 = vmax.xlane.f32.xlu0 %v159_v32 }
  0xa6   :  { %v155_v35 = vpop.f32.mrf.mxu2 }
  0xa7   :  { %v156_v37 = vadd.f32 %v155_v35, %v76_v25 }
  0xa9   :  { %v162_v39 = vmax.f32 %v128_v36, %v156_v37 }
  0xab   :  { %v163_v40 = vmax.f32 %v162_v39, %v142_v38 }
  0xad   :  { %164 = vmax.xlane.f32.xlu0 %v163_v40 }
 0x118   :  { %v161_v41 = vpop.xlane.xlu0 %160 }
 0x119   :  { %v166_v42 = vsub.f32 %v126_v27, %v161_v41  ;;  %v167_v43 = vsub.f32 %v140_v29, %v161_v41  ;;  %v168_v44 = vsub.f32 %v154_v30, %v161_v41 }
 0x11b   :  { %v172_v45 = vmul.f32 1.442695, %v166_v42  ;;  %v174_v46 = vmul.f32 1.442695, %v167_v43  ;;  %v176_v47 = vmul.f32 1.442695, %v168_v44 }
 0x11d   :  { %298 = vpow2.f32 %v172_v45 }
 0x11e   :  { %300 = vpow2.f32 %v174_v46 }
 0x11f   :  { %302 = vpow2.f32 %v176_v47 }
 0x120   :  { %v165_v48 = vpop.xlane.xlu0 %164 }
 0x121   :  { %v169_v49 = vsub.f32 %v128_v36, %v165_v48  ;;  %v170_v50 = vsub.f32 %v142_v38, %v165_v48  ;;  %v171_v51 = vsub.f32 %v156_v37, %v165_v48 }
 0x123   :  { %v299_v52 = vpop.eup %298  ;;  %v178_v53 = vmul.f32 1.442695, %v169_v49  ;;  %v180_v54 = vmul.f32 1.442695, %v170_v50  ;;  %v182_v56 = vmul.f32 1.442695, %v171_v51 }
 0x124   :  { %v301_v55 = vpop.eup %300 }
 0x125   :  { %304 = vpow2.f32 %v178_v53  ;;  %v184_v57 = vadd.f32 %v301_v55, %v299_v52  ;;  %v303_v58 = vpop.eup %302 }
 0x126   :  { %306 = vpow2.f32 %v180_v54 }
 0x127   :  { %v185_v59 = vadd.f32 %v303_v58, %v184_v57  ;;  %308 = vpow2.f32 %v182_v56 }
 0x129   :  { %186 = vadd.xlane.f32.xlu1 %v185_v59 }
 0x12b   :  { %v305_v60 = vpop.eup %304 }
 0x12c   :  { %v307_v61 = vpop.eup %306 }
 0x12d   :  { %v188_v62 = vadd.f32 %v307_v61, %v305_v60  ;;  %v309_v63 = vpop.eup %308 }
 0x12f   :  { %v189_v0 = vadd.f32 %v309_v63, %v188_v62 }
 0x131   :  { %190 = vadd.xlane.f32.xlu1 %v189_v0 }
 0x19c   :  { %v187_v1 = vpop.xlane.xlu1 %186 }
 0x19d   :  { %310 = vrcp.f32 %v187_v1  ;;  %v203_v6 = vand.u32 2147483648, %v187_v1  ;;  %v201_v8 = vand.u32 2147483647, %v187_v1  ;;  %vm197_vm2 = vweird.f32 %v187_v1 }
 0x19f   :  { %v204_v11 = vor.u32 1.1754944e-38, %v203_v6  ;;  %vm202_vm4 = vcmp.eq.f32.partialorder %v201_v8, 8.507059e+37 }
 0x1a3   :  { %v311_v2 = vpop.eup %310 }
 0x1a4   :  { %v193_v3 = vmul.f32 %v311_v2, %v187_v1  ;;  %v191_v4 = vpop.xlane.xlu1 %190  ;;  %vm198_vm1 = vweird.f32 %v311_v2 }
 0x1a5   :  { %312 = vrcp.f32 %v191_v4  ;;  %vm199_vm3 = vmor %vm197_vm2, %vm198_vm1  ;;  %v218_v19 = vand.u32 2147483648, %v191_v4  ;;  %v216_v21 = vand.u32 2147483647, %v191_v4  ;;  %vm212_vm7 = vweird.f32 %v191_v4 }
 0x1a6   :  { %v194_v5 = vsub.f32 1.0, %v193_v3 }
 0x1a7   :  { %v219_v23 = vor.u32 1.1754944e-38, %v218_v19  ;;  %vm217_vm9 = vcmp.eq.f32.partialorder %v216_v21, 8.507059e+37 }
 0x1a8   :  { %v195_v7 = vmul.f32 %v311_v2, %v194_v5 }
 0x1aa   :  { %v196_v9 = vadd.f32 %v311_v2, %v195_v7 }
 0x1ab   :  { %v313_v10 = vpop.eup %312 }
 0x1ac   :  { %v200_v12 = vsel %vm199_vm3, %v311_v2, %v196_v9  ;;  %v208_v13 = vmul.f32 %v313_v10, %v191_v4  ;;  %vm213_vm6 = vweird.f32 %v313_v10 }
 0x1ad   :  { %v205_v14 = vsel %vm202_vm4, %v204_v11, %v200_v12  ;;  %vm214_vm8 = vmor %vm212_vm7, %vm213_vm6 }
 0x1ae   :  { %v222_v15 = vmul.f32 %v299_v52, %v205_v14  ;;  %v223_v16 = vmul.f32 %v301_v55, %v205_v14  ;;  %v224_v17 = vmul.f32 %v303_v58, %v205_v14  ;;  %v209_v18 = vsub.f32 1.0, %v208_v13 }
 0x1b0   :  { %228 = vst [vmem:[#allocation8] sm:$0xff] %v222_v15  ;;  %v210_v20 = vmul.f32 %v313_v10, %v209_v18 }
 0x1b1   :  { %229 = vst [vmem:[#allocation8 + $0x8] sm:$0xff] %v223_v16 }
 0x1b2   :  { %231 = vst.msk [vmem:[#allocation8 + $0x10] sm:$0xff] %vm230_vm5, %v224_v17  ;;  %v211_v22 = vadd.f32 %v313_v10, %v210_v20 }
 0x1b4   :  { %v215_v24 = vsel %vm214_vm8, %v313_v10, %v211_v22 }
 0x1b5   :  { %v220_v25 = vsel %vm217_vm9, %v219_v23, %v215_v24 }
 0x1b6   :  { %v225_v26 = vmul.f32 %v305_v60, %v220_v25  ;;  %v226_v27 = vmul.f32 %v307_v61, %v220_v25  ;;  %v227_v28 = vmul.f32 %v309_v63, %v220_v25 }
 0x1b8   :  { %232 = vst [vmem:[#allocation8 + $0x18] sm:$0xff] %v225_v26 }
 0x1b9   :  { %233 = vst [vmem:[#allocation8 + $0x20] sm:$0xff] %v226_v27 }
 0x1ba   :  { %234 = vst.msk [vmem:[#allocation8 + $0x28] sm:$0xff] %vm230_vm5, %v227_v28 }
 0x1bb   :  { %247 = dma.vmem_to_hbm [thread:$0]  %s240_s2, 768, %s242_s5, [#allocation4], %s424_s6, %s424_s6, %s425_s7  }
 0x1bc   :  { %414 = dma.done.wait [#allocation4], 768  }
 0x1bd   :  { %415 = vsyncadd [#allocation4], 4294966528 }
 0x1be   :  { %252 = vsyncpa [#allocation3], 1 }
 0x1bf   :  { %253 = vsyncpa [#allocation6], 1 }
 0x1c0   :  { %254 = vsyncpa [#allocation4], 1 }

</bundles_post_ra>
